<compile_context>
chip_gen: v7x
topology: tpu7x:2x2x1
jax: 0.10.0
libtpu: 0.0.40
codegen_flags: <defaults>
</compile_context>

<pallas_src>
import jax
import jax.numpy as jnp
from jax.experimental import pallas as pl
from jax.experimental.pallas import tpu as pltpu


def _basic_block_kernel(x_ref, w1_ref, s1_ref, b1_ref,
                        w2_ref, s2_ref, b2_ref, o_ref):
    # x_ref  : (N, H, W*C)   f32 packed NHWC input (lane index = w*C + c)
    # w*_ref : (3*W*C, W*C)  bf16 fused kh-tap block-banded conv weights
    # s*/b*  : (1, W*C)      f32 folded BN scale / bias (tiled over W)
    # o_ref  : (N, H, W*C)   f32 output
    N, H, WC = x_ref.shape
    NH = N * H
    mxu_dtype = w1_ref.dtype

    x3 = x_ref[...]  # (N, H, WC) f32 — also the residual

    def conv3x3(rows3_f32, w_ref):
        # rows3_f32: (N, H, WC) f32.  Cast once, shift rows within each image
        # (height zero-padding), fuse the 3 kh taps along K, one MXU matmul.
        rows = rows3_f32.astype(mxu_dtype)                        # (N, H, WC)
        zrow = jnp.zeros((N, 1, WC), mxu_dtype)
        up = jnp.concatenate([zrow, rows[:, :-1]], axis=1)        # row h-1
        down = jnp.concatenate([rows[:, 1:], zrow], axis=1)       # row h+1
        lhs = jnp.concatenate([up, rows, down], axis=-1)          # (N, H, 3*WC)
        return jnp.dot(lhs.reshape(NH, 3 * WC), w_ref[...],
                       preferred_element_type=jnp.float32)        # (NH, WC) f32

    # conv1 -> bn1 -> relu   (f32 elementwise math)
    out1 = jnp.maximum(conv3x3(x3, w1_ref) * s1_ref[...] + b1_ref[...], 0.0)

    # conv2 -> bn2
    out2 = conv3x3(out1.reshape(N, H, WC), w2_ref) * s2_ref[...] + b2_ref[...]

    # residual add (pre-conv input) + relu
    res = jnp.maximum(out2 + x3.reshape(NH, WC), 0.0)
    o_ref[...] = res.reshape(N, H, WC).astype(o_ref.dtype)


def _pack_conv_weight(w_oihw, width, dtype):
    """OIHW (Co,Ci,3,3) -> fused (3*width*Ci, width*Co) block-banded matrix.

    Per-kh block: mat[kh][wi*Ci + ci, wo*Co + co] = w[co, ci, kh, kw] with
    kw = wi - wo + 1, zero outside kw in [0, 3).  The three kh blocks are
    stacked along rows (K) in the order [kh=0 | kh=1 | kh=2] to match the
    in-kernel LHS layout [up | mid | down]; width zero-padding comes free.
    """
    w_hwio = jnp.transpose(w_oihw, (2, 3, 1, 0)).astype(jnp.float32)  # (3,3,Ci,Co)
    ci, co = w_hwio.shape[2], w_hwio.shape[3]
    mats = []
    for kh in range(3):
        m = jnp.zeros((width * ci, width * co), jnp.float32)
        for kw in range(3):
            # S[wi, wo] = 1 iff wi = wo + (kw - 1)
            shift = jnp.eye(width, k=-(kw - 1), dtype=jnp.float32)
            m = m + jnp.kron(shift, w_hwio[kh, kw])
        mats.append(m)
    return jnp.concatenate(mats, axis=0).astype(dtype)   # (3*W*Ci, W*Co)


def prepare_basic_block_params(w1_oihw, gamma1, beta1, mean1, var1,
                               w2_oihw, gamma2, beta2, mean2, var2,
                               width, eps=1e-5, mxu_dtype=jnp.bfloat16):
    """One-time parameter prep (hoisted out of the per-call path)."""
    C = w1_oihw.shape[0]
    assert w1_oihw.shape == (C, C, 3, 3) and w2_oihw.shape == (C, C, 3, 3)
    WC = width * C
    assert WC == 128, f"lane-dense packing requires W*C == 128, got {WC}"

    w1k = _pack_conv_weight(w1_oihw, width, mxu_dtype)   # (3*WC, WC)
    w2k = _pack_conv_weight(w2_oihw, width, mxu_dtype)

    inv1 = gamma1 / jnp.sqrt(var1 + eps)
    inv2 = gamma2 / jnp.sqrt(var2 + eps)
    s1 = jnp.tile(inv1, width).reshape(1, WC).astype(jnp.float32)
    b1 = jnp.tile(beta1 - mean1 * inv1, width).reshape(1, WC).astype(jnp.float32)
    s2 = jnp.tile(inv2, width).reshape(1, WC).astype(jnp.float32)
    b2 = jnp.tile(beta2 - mean2 * inv2, width).reshape(1, WC).astype(jnp.float32)
    return (w1k, s1, b1, w2k, s2, b2)


def pack_nchw(x_nchw):
    """NCHW -> packed (N, H, W*C) f32; lane index = w*C + c."""
    N, C, H, W = x_nchw.shape
    return jnp.transpose(x_nchw, (0, 2, 3, 1)).reshape(N, H, W * C).astype(jnp.float32)


def unpack_to_nchw(x_packed, channels):
    N, H, WC = x_packed.shape
    W = WC // channels
    return jnp.transpose(x_packed.reshape(N, H, W, channels), (0, 3, 1, 2))


def basic_block_forward_packed(x_packed, params):
    """Fused BasicBlock on packed (N, H, W*C) activations (chainable)."""
    w1k, s1, b1, w2k, s2, b2 = params
    N, H, WC = x_packed.shape
    assert WC == 128, f"lane-dense packing requires W*C == 128, got {WC}"
    assert H % 8 == 0, f"H must be a multiple of 8, got {H}"

    mxu_bytes = jnp.dtype(w1k.dtype).itemsize
    cost = pl.CostEstimate(
        flops=2 * 2 * (N * H) * (3 * WC) * WC,          # 2 convs, fused K=3*WC
        transcendentals=0,
        bytes_accessed=2 * N * H * WC * 4
        + 2 * 3 * WC * WC * mxu_bytes + 4 * WC * 4,
    )

    grid_spec = pltpu.PrefetchScalarGridSpec(
        num_scalar_prefetch=0,
        grid=(1,),                         # single step: whole batch at once
        in_specs=[
            pl.BlockSpec((N, H, WC), lambda i: (0, 0, 0)),
            pl.BlockSpec((3 * WC, WC), lambda i: (0, 0)),
            pl.BlockSpec((1, WC), lambda i: (0, 0)),
            pl.BlockSpec((1, WC), lambda i: (0, 0)),
            pl.BlockSpec((3 * WC, WC), lambda i: (0, 0)),
            pl.BlockSpec((1, WC), lambda i: (0, 0)),
            pl.BlockSpec((1, WC), lambda i: (0, 0)),
        ],
        out_specs=pl.BlockSpec((N, H, WC), lambda i: (0, 0, 0)),
    )

    return pl.pallas_call(
        _basic_block_kernel,
        out_shape=jax.ShapeDtypeStruct((N, H, WC), jnp.float32),
        grid_spec=grid_spec,
        compiler_params=pltpu.CompilerParams(
            dimension_semantics=("arbitrary",)),
        cost_estimate=cost,
    )(x_packed, w1k, s1, b1, w2k, s2, b2)


def basic_block_forward(x_nchw, params):
    """Convenience wrapper: NCHW in/out around the packed kernel.

    For chained BasicBlocks, call basic_block_forward_packed directly and keep
    activations in the packed layout between blocks.
    """
    C = x_nchw.shape[1]
    out_packed = basic_block_forward_packed(pack_nchw(x_nchw), params)
    return unpack_to_nchw(out_packed, C)


def basic_block_reference(x_nchw,
                          w1_oihw, gamma1, beta1, mean1, var1,
                          w2_oihw, gamma2, beta2, mean2, var2,
                          eps=1e-5):
    """Plain-JAX f32 reference (NCHW, same eval-mode BN folding)."""
    def conv(x, w):
        return jax.lax.conv_general_dilated(
            x, w, window_strides=(1, 1), padding=((1, 1), (1, 1)),
            dimension_numbers=('NCHW', 'OIHW', 'NCHW'))

    def bn(x, gamma, beta, mean, var):
        inv = gamma / jnp.sqrt(var + eps)
        return x * inv.reshape(1, -1, 1, 1) + (beta - mean * inv).reshape(1, -1, 1, 1)

    out = jnp.maximum(bn(conv(x_nchw, w1_oihw), gamma1, beta1, mean1, var1), 0.0)
    out = bn(conv(out, w2_oihw), gamma2, beta2, mean2, var2)
    return jnp.maximum(out + x_nchw, 0.0)


if __name__ == "__main__":
    key = jax.random.PRNGKey(0)
    N, C, H, W = 2, 8, 16, 16   # inplanes == planes == 8, stride=1, kernel_size=3
    ks = jax.random.split(key, 11)

    x = jax.random.normal(ks[0], (N, C, H, W), jnp.float32)
    w1 = jax.random.normal(ks[1], (C, C, 3, 3), jnp.float32) * 0.1
    w2 = jax.random.normal(ks[2], (C, C, 3, 3), jnp.float32) * 0.1
    gamma1 = jax.random.uniform(ks[3], (C,), jnp.float32, 0.5, 1.5)
    beta1 = jax.random.normal(ks[4], (C,), jnp.float32) * 0.1
    mean1 = jax.random.normal(ks[5], (C,), jnp.float32) * 0.1
    var1 = jax.random.uniform(ks[6], (C,), jnp.float32, 0.5, 1.5)
    gamma2 = jax.random.uniform(ks[7], (C,), jnp.float32, 0.5, 1.5)
    beta2 = jax.random.normal(ks[8], (C,), jnp.float32) * 0.1
    mean2 = jax.random.normal(ks[9], (C,), jnp.float32) * 0.1
    var2 = jax.random.uniform(ks[10], (C,), jnp.float32, 0.5, 1.5)

    # One-time parameter prep (weight packing + BN folding), outside the
    # steady-state forward path.
    params = jax.block_until_ready(
        prepare_basic_block_params(w1, gamma1, beta1, mean1, var1,
                                   w2, gamma2, beta2, mean2, var2, W))

    fwd = jax.jit(basic_block_forward)
    out = jax.block_until_ready(fwd(x, params))

    ref = jax.block_until_ready(
        basic_block_reference(x, w1, gamma1, beta1, mean1, var1,
                              w2, gamma2, beta2, mean2, var2))

    assert out.shape == (N, C, H, W)
    max_err = float(jnp.max(jnp.abs(out - ref)))
    # bf16 MXU operands (f32 accumulation) -> bf16-level tolerance
    assert jnp.allclose(out, ref, atol=3e-2, rtol=3e-2), \
        f"max abs err = {max_err}"

    print("KERNEL_OK")
</pallas_src>

<mosaic_0001>
module attributes {stable_mosaic.version = 11 : i64} {
  func.func @_basic_block_kernel(%arg0: i32, %arg1: memref<2x16x128xf32, #tpu.memory_space<vmem>>, %arg2: memref<384x128xbf16, #tpu.memory_space<vmem>>, %arg3: memref<1x128xf32, #tpu.memory_space<vmem>>, %arg4: memref<1x128xf32, #tpu.memory_space<vmem>>, %arg5: memref<384x128xbf16, #tpu.memory_space<vmem>>, %arg6: memref<1x128xf32, #tpu.memory_space<vmem>>, %arg7: memref<1x128xf32, #tpu.memory_space<vmem>>, %arg8: memref<2x16x128xf32, #tpu.memory_space<vmem>>) attributes {dimension_semantics = [#tpu.dimension_semantics<arbitrary>], iteration_bounds = array<i64: 1>, scalar_prefetch = 0 : i64, scratch_operands = 0 : i64, tpu.core_type = #tpu.core_type<tc>, window_params = [{pipeline_mode = #tpu.pipeline_mode<synchronous>, transform_indices = @transform_0, window_bounds = array<i64: 2, 16, 128>}, {pipeline_mode = #tpu.pipeline_mode<synchronous>, transform_indices = @transform_1, window_bounds = array<i64: 384, 128>}, {pipeline_mode = #tpu.pipeline_mode<synchronous>, transform_indices = @transform_2, window_bounds = array<i64: 1, 128>}, {pipeline_mode = #tpu.pipeline_mode<synchronous>, transform_indices = @transform_3, window_bounds = array<i64: 1, 128>}, {pipeline_mode = #tpu.pipeline_mode<synchronous>, transform_indices = @transform_4, window_bounds = array<i64: 384, 128>}, {pipeline_mode = #tpu.pipeline_mode<synchronous>, transform_indices = @transform_5, window_bounds = array<i64: 1, 128>}, {pipeline_mode = #tpu.pipeline_mode<synchronous>, transform_indices = @transform_6, window_bounds = array<i64: 1, 128>}, {pipeline_mode = #tpu.pipeline_mode<synchronous>, transform_indices = @transform_7, window_bounds = array<i64: 2, 16, 128>}]} {
    %c0 = arith.constant 0 : index
    %c0_0 = arith.constant 0 : index
    %c0_1 = arith.constant 0 : index
    %0 = vector.load %arg1[%c0, %c0_0, %c0_1] : memref<2x16x128xf32, #tpu.memory_space<vmem>>, vector<2x16x128xf32>
    %1 = arith.truncf %0 : vector<2x16x128xf32> to vector<2x16x128xbf16>
    %cst = arith.constant 0.000000e+00 : bf16
    %2 = vector.broadcast %cst : bf16 to vector<2x1x128xbf16>
    %3 = vector.extract_strided_slice %1 {offsets = [0, 0, 0], sizes = [2, 15, 128], strides = [1, 1, 1]} : vector<2x16x128xbf16> to vector<2x15x128xbf16>
    %4 = tpu.concatenate %2, %3 in 1 : vector<2x1x128xbf16>, vector<2x15x128xbf16> -> vector<2x16x128xbf16>
    %5 = vector.extract_strided_slice %1 {offsets = [0, 1, 0], sizes = [2, 15, 128], strides = [1, 1, 1]} : vector<2x16x128xbf16> to vector<2x15x128xbf16>
    %6 = tpu.concatenate %5, %2 in 1 : vector<2x15x128xbf16>, vector<2x1x128xbf16> -> vector<2x16x128xbf16>
    %7 = tpu.concatenate %4, %1, %6 in 2 : vector<2x16x128xbf16>, vector<2x16x128xbf16>, vector<2x16x128xbf16> -> vector<2x16x384xbf16>
    %8 = vector.shape_cast %7 : vector<2x16x384xbf16> to vector<32x384xbf16>
    %c0_2 = arith.constant 0 : index
    %c0_3 = arith.constant 0 : index
    %9 = vector.load %arg2[%c0_2, %c0_3] : memref<384x128xbf16, #tpu.memory_space<vmem>>, vector<384x128xbf16>
    %cst_4 = arith.constant dense<0.000000e+00> : vector<32x128xf32>
    %10 = tpu.matmul %8, %9, %cst_4 {dimension_numbers = #tpu.dot_dimension_numbers<[1], [0], [0], [1], [0, 0, 1, 1], [], []>} : vector<32x384xbf16>, vector<384x128xbf16>, vector<32x128xf32> -> vector<32x128xf32>
    %c0_5 = arith.constant 0 : index
    %c0_6 = arith.constant 0 : index
    %11 = vector.load %arg3[%c0_5, %c0_6] : memref<1x128xf32, #tpu.memory_space<vmem>>, vector<1x128xf32>
    %12 = vector.broadcast %11 : vector<1x128xf32> to vector<32x128xf32>
    %13 = arith.mulf %10, %12 : vector<32x128xf32>
    %c0_7 = arith.constant 0 : index
    %c0_8 = arith.constant 0 : index
    %14 = vector.load %arg4[%c0_7, %c0_8] : memref<1x128xf32, #tpu.memory_space<vmem>>, vector<1x128xf32>
    %15 = vector.broadcast %14 : vector<1x128xf32> to vector<32x128xf32>
    %16 = arith.addf %13, %15 : vector<32x128xf32>
    %cst_9 = arith.constant 0.000000e+00 : f32
    %17 = vector.broadcast %cst_9 : f32 to vector<32x128xf32>
    %18 = arith.maximumf %16, %17 : vector<32x128xf32>
    %19 = vector.shape_cast %18 : vector<32x128xf32> to vector<2x16x128xf32>
    %20 = arith.truncf %19 : vector<2x16x128xf32> to vector<2x16x128xbf16>
    %cst_10 = arith.constant 0.000000e+00 : bf16
    %21 = vector.broadcast %cst_10 : bf16 to vector<2x1x128xbf16>
    %22 = vector.extract_strided_slice %20 {offsets = [0, 0, 0], sizes = [2, 15, 128], strides = [1, 1, 1]} : vector<2x16x128xbf16> to vector<2x15x128xbf16>
    %23 = tpu.concatenate %21, %22 in 1 : vector<2x1x128xbf16>, vector<2x15x128xbf16> -> vector<2x16x128xbf16>
    %24 = vector.extract_strided_slice %20 {offsets = [0, 1, 0], sizes = [2, 15, 128], strides = [1, 1, 1]} : vector<2x16x128xbf16> to vector<2x15x128xbf16>
    %25 = tpu.concatenate %24, %21 in 1 : vector<2x15x128xbf16>, vector<2x1x128xbf16> -> vector<2x16x128xbf16>
    %26 = tpu.concatenate %23, %20, %25 in 2 : vector<2x16x128xbf16>, vector<2x16x128xbf16>, vector<2x16x128xbf16> -> vector<2x16x384xbf16>
    %27 = vector.shape_cast %26 : vector<2x16x384xbf16> to vector<32x384xbf16>
    %c0_11 = arith.constant 0 : index
    %c0_12 = arith.constant 0 : index
    %28 = vector.load %arg5[%c0_11, %c0_12] : memref<384x128xbf16, #tpu.memory_space<vmem>>, vector<384x128xbf16>
    %cst_13 = arith.constant dense<0.000000e+00> : vector<32x128xf32>
    %29 = tpu.matmul %27, %28, %cst_13 {dimension_numbers = #tpu.dot_dimension_numbers<[1], [0], [0], [1], [0, 0, 1, 1], [], []>} : vector<32x384xbf16>, vector<384x128xbf16>, vector<32x128xf32> -> vector<32x128xf32>
    %c0_14 = arith.constant 0 : index
    %c0_15 = arith.constant 0 : index
    %30 = vector.load %arg6[%c0_14, %c0_15] : memref<1x128xf32, #tpu.memory_space<vmem>>, vector<1x128xf32>
    %31 = vector.broadcast %30 : vector<1x128xf32> to vector<32x128xf32>
    %32 = arith.mulf %29, %31 : vector<32x128xf32>
    %c0_16 = arith.constant 0 : index
    %c0_17 = arith.constant 0 : index
    %33 = vector.load %arg7[%c0_16, %c0_17] : memref<1x128xf32, #tpu.memory_space<vmem>>, vector<1x128xf32>
    %34 = vector.broadcast %33 : vector<1x128xf32> to vector<32x128xf32>
    %35 = arith.addf %32, %34 : vector<32x128xf32>
    %36 = vector.shape_cast %0 : vector<2x16x128xf32> to vector<32x128xf32>
    %37 = arith.addf %35, %36 : vector<32x128xf32>
    %cst_18 = arith.constant 0.000000e+00 : f32
    %38 = vector.broadcast %cst_18 : f32 to vector<32x128xf32>
    %39 = arith.maximumf %37, %38 : vector<32x128xf32>
    %40 = vector.shape_cast %39 : vector<32x128xf32> to vector<2x16x128xf32>
    %c0_19 = arith.constant 0 : index
    %c0_20 = arith.constant 0 : index
    %c0_21 = arith.constant 0 : index
    %41 = vector.load %arg8[%c0_19, %c0_20, %c0_21] : memref<2x16x128xf32, #tpu.memory_space<vmem>>, vector<2x16x128xf32>
    tpu.vector_store %arg8[%c0_19, %c0_20, %c0_21], %40 {strides = array<i32>} : memref<2x16x128xf32, #tpu.memory_space<vmem>>, vector<2x16x128xf32>,
    return
  }
  func.func @transform_0(%arg0: i32) -> (i32, i32, i32) {
    %c0_i32 = arith.constant 0 : i32
    %c0_i32_0 = arith.constant 0 : i32
    %c0_i32_1 = arith.constant 0 : i32
    %c0_i32_2 = arith.constant 0 : i32
    return %c0_i32, %c0_i32_0, %c0_i32_1 : i32, i32, i32
  }
  func.func @transform_1(%arg0: i32) -> (i32, i32) {
    %c0_i32 = arith.constant 0 : i32
    %c0_i32_0 = arith.constant 0 : i32
    %c0_i32_1 = arith.constant 0 : i32
    return %c0_i32, %c0_i32_0 : i32, i32
  }
  func.func @transform_2(%arg0: i32) -> (i32, i32) {
    %c0_i32 = arith.constant 0 : i32
    %c0_i32_0 = arith.constant 0 : i32
    %c0_i32_1 = arith.constant 0 : i32
    return %c0_i32, %c0_i32_0 : i32, i32
  }
  func.func @transform_3(%arg0: i32) -> (i32, i32) {
    %c0_i32 = arith.constant 0 : i32
    %c0_i32_0 = arith.constant 0 : i32
    %c0_i32_1 = arith.constant 0 : i32
    return %c0_i32, %c0_i32_0 : i32, i32
  }
  func.func @transform_4(%arg0: i32) -> (i32, i32) {
    %c0_i32 = arith.constant 0 : i32
    %c0_i32_0 = arith.constant 0 : i32
    %c0_i32_1 = arith.constant 0 : i32
    return %c0_i32, %c0_i32_0 : i32, i32
  }
  func.func @transform_5(%arg0: i32) -> (i32, i32) {
    %c0_i32 = arith.constant 0 : i32
    %c0_i32_0 = arith.constant 0 : i32
    %c0_i32_1 = arith.constant 0 : i32
    return %c0_i32, %c0_i32_0 : i32, i32
  }
  func.func @transform_6(%arg0: i32) -> (i32, i32) {
    %c0_i32 = arith.constant 0 : i32
    %c0_i32_0 = arith.constant 0 : i32
    %c0_i32_1 = arith.constant 0 : i32
    return %c0_i32, %c0_i32_0 : i32, i32
  }
  func.func @transform_7(%arg0: i32) -> (i32, i32, i32) {
    %c0_i32 = arith.constant 0 : i32
    %c0_i32_0 = arith.constant 0 : i32
    %c0_i32_1 = arith.constant 0 : i32
    %c0_i32_2 = arith.constant 0 : i32
    return %c0_i32, %c0_i32_0, %c0_i32_1 : i32, i32, i32
  }
}

</mosaic_0001>

<bundles_post_ra>
// kernel: basic_block_forward.1
= control target key start
LH: loop header
LB: loop body
LE: loop exit
PB: predicated region body
PF: predicated region fallthrough
CT: control target
= control target key end

     0   :  { %vm60_vm0 = vcmask 1047552   ;;  %vm61_vm1 = vsmask.f32 7424  ;;  %vm49_vm2 = vcmask 1040384   ;;  %vm50_vm3 = vsmask.f32 256  ;;  %s1217_s1 = inlined_call_operand.vmem [shape: bf16[384,128], index: 1, kind: input, shape index: {}]   ;;  %s1218_s0 = inlined_call_operand.vmem [shape: f32[2,16,128], index: 0, kind: input, shape index: {}]   ;;  %s1219_s4 = inlined_call_operand.vmem [shape: bf16[384,128], index: 4, kind: input, shape index: {}]   ;;  %s1220_s2 = inlined_call_operand.vmem [shape: f32[1,128], index: 2, kind: input, shape index: {}]   ;;  %s1221_s3 = inlined_call_operand.vmem [shape: f32[1,128], index: 3, kind: input, shape index: {}]   ;;  %s1222_s5 = inlined_call_operand.vmem [shape: f32[1,128], index: 5, kind: input, shape index: {}]   ;;  %s1223_s6 = inlined_call_operand.vmem [shape: f32[1,128], index: 6, kind: input, shape index: {}]   ;;  %s1224_s7 = inlined_call_operand.vmem [shape: f32[2,16,128], index: 7, kind: output, shape index: {}]  }
   0x1   :  { %v905_v0 = vld [vmem:[%s1217_s1 + $0x40] sm:$0xff]   ;;  %v908_v3 = vld [vmem:[%s1217_s1 + $0x48] sm:$0xff]   ;;  %v911_v6 = vld [vmem:[%s1217_s1 + $0x50] sm:$0xff]  }
   0x2   :  { %v906_v1 = vld [vmem:[%s1217_s1 + $0x80] sm:$0xff]   ;;  %789 = vmatprep.subr.bf16.mxu0 %v905_v0  ;;  %v909_v4 = vld [vmem:[%s1217_s1 + $0x88] sm:$0xff]   ;;  %v912_v7 = vld [vmem:[%s1217_s1 + $0x90] sm:$0xff]  }
   0x3   :  { %v907_v2 = vld [vmem:[%s1217_s1] sm:$0xff]   ;;  %865 = vmatprep.subr.bf16.mxu1 %v906_v1  ;;  %v910_v5 = vld [vmem:[%s1217_s1 + $0x8] sm:$0xff]   ;;  %v913_v8 = vld [vmem:[%s1217_s1 + $0x10] sm:$0xff]  }
   0x4   :  { %790 = vmatpush3.bf16.msra.mxu0 %v907_v2  ;;  %866 = vmatpush3.bf16.msra.mxu1 %v906_v1  ;;  %v914_v9 = vld [vmem:[%s1217_s1 + $0x58] sm:$0xff]   ;;  %v917_v12 = vld [vmem:[%s1217_s1 + $0x60] sm:$0xff]   ;;  %v920_v15 = vld [vmem:[%s1217_s1 + $0x68] sm:$0xff]  }
   0x5   :  { %791 = vmatprep.subr.bf16.mxu0 %v908_v3  ;;  %867 = vmatprep.subr.bf16.mxu1 %v909_v4  ;;  %v915_v10 = vld [vmem:[%s1217_s1 + $0x98] sm:$0xff]   ;;  %v918_v13 = vld [vmem:[%s1217_s1 + $0xa0] sm:$0xff]   ;;  %v921_v16 = vld [vmem:[%s1217_s1 + $0xa8] sm:$0xff]  }
   0x6   :  { %v916_v11 = vld [vmem:[%s1217_s1 + $0x18] sm:$0xff]   ;;  %v919_v14 = vld [vmem:[%s1217_s1 + $0x20] sm:$0xff]   ;;  %v922_v17 = vld [vmem:[%s1217_s1 + $0x28] sm:$0xff]  }
   0x7   :  { %v923_v18 = vld [vmem:[%s1217_s1 + $0x70] sm:$0xff]   ;;  %v926_v21 = vld [vmem:[%s1217_s1 + $0x78] sm:$0xff]   ;;  %v1062_v22 = vld [vmem:[%s1218_s0] sm:$0xff] }
   0x8   :  { %792 = vmatpush3.bf16.msra.mxu0 %v910_v5  ;;  %868 = vmatpush3.bf16.msra.mxu1 %v909_v4  ;;  %v924_v19 = vld [vmem:[%s1217_s1 + $0xb0] sm:$0xff]   ;;  %v1067_v23 = vld [vmem:[%s1218_s0 + $0x8] sm:$0xff]  ;;  %v927_v24 = vld [vmem:[%s1217_s1 + $0xb8] sm:$0xff]  }
   0x9   :  { %793 = vmatprep.subr.bf16.mxu0 %v911_v6  ;;  %869 = vmatprep.subr.bf16.mxu1 %v912_v7  ;;  %v925_v20 = vld [vmem:[%s1217_s1 + $0x30] sm:$0xff]   ;;  %v31_v25 = vpack.c.bf16 %v1067_v23, %v1062_v22  ;;  %v1082_v27 = vld [vmem:[%s1218_s0 + $0x18] sm:$0xff]  ;;  %v929_v34 = vld [vmem:[%s1219_s4 + $0x40] sm:$0xff]  }
   0xa   :  { %v1077_v26 = vld [vmem:[%s1218_s0 + $0x10] sm:$0xff]  ;;  %v928_v31 = vld [vmem:[%s1217_s1 + $0x38] sm:$0xff]   ;;  %vm1094_vm4 = vmand %vm60_vm0, %vm61_vm1 }
   0xb   :  { %v32_v28 = vpack.c.bf16 %v1082_v27, %v1077_v26  ;;  %289 = vmatprep.mubr.bf16.mxu0 %v31_v25  ;;  %v34_v29 = vshrl.u32 %v31_v25, 16  ;;  %v37_v30 = vshll.u32 %v31_v25, 16  ;;  %vm1100_vm5 = vmand %vm49_vm2, %vm50_vm3  ;;  %v930_v41 = vld [vmem:[%s1219_s4] sm:$0xff]   ;;  %v931_v44 = vld [vmem:[%s1219_s4 + $0x48] sm:$0xff]  }
   0xc   :  { %794 = vmatpush3.bf16.msra.mxu0 %v913_v8  ;;  %870 = vmatpush3.bf16.msra.mxu1 %v912_v7  ;;  %v934_v47 = vld [vmem:[%s1219_s4 + $0x80] sm:$0xff]   ;;  %v932_v52 = vld [vmem:[%s1219_s4 + $0x8] sm:$0xff]   ;;  %v933_v53 = vld [vmem:[%s1219_s4 + $0x50] sm:$0xff]  }
   0xd   :  { %795 = vmatprep.subr.bf16.mxu0 %v914_v9  ;;  %871 = vmatprep.subr.bf16.mxu1 %v915_v10  ;;  %v41_v32 = vshrl.u32 %v32_v28, 16  ;;  %v44_v33 = vshll.u32 %v32_v28, 16  ;;  %v54_v35 = vrot.slane %v37_v30, 1  ;;  %v36_v37 = vrot.slane %v34_v29, 7  ;;  %v935_v54 = vld [vmem:[%s1219_s4 + $0x10] sm:$0xff]   ;;  %v936_v55 = vld [vmem:[%s1219_s4 + $0x58] sm:$0xff]  }
   0xe   :  { %v937_v56 = vld [vmem:[%s1219_s4 + $0x88] sm:$0xff]   ;;  %v938_v57 = vld [vmem:[%s1219_s4 + $0x18] sm:$0xff]   ;;  %v939_v58 = vld [vmem:[%s1219_s4 + $0x60] sm:$0xff]  }
   0xf   :  { %v56_v39 = vrot.slane %v44_v33, 1  ;;  %v43_v40 = vrot.slane %v41_v32, 7  ;;  %v55_v42 = vor.u32 %v54_v35, %v34_v29  ;;  %v39_v43 = vor.u32 %v37_v30, %v36_v37  ;;  %v940_v59 = vld [vmem:[%s1219_s4 + $0x90] sm:$0xff]   ;;  %v941_v60 = vld [vmem:[%s1219_s4 + $0x20] sm:$0xff]   ;;  %v942_v61 = vld [vmem:[%s1219_s4 + $0x68] sm:$0xff]  }
  0x10   :  { %796 = vmatpush3.bf16.msra.mxu0 %v916_v11  ;;  %872 = vmatpush3.bf16.msra.mxu1 %v915_v10  ;;  %v943_v62 = vld [vmem:[%s1219_s4 + $0x98] sm:$0xff]   ;;  %v944_v63 = vld [vmem:[%s1219_s4 + $0x28] sm:$0xff]   ;;  %v945_v0 = vld [vmem:[%s1219_s4 + $0x70] sm:$0xff]  }
  0x11   :  { %797 = vmatprep.subr.bf16.mxu0 %v917_v12  ;;  %873 = vmatprep.subr.bf16.mxu1 %v918_v13  ;;  %v57_v45 = vor.u32 %v56_v39, %v41_v32  ;;  %v46_v46 = vor.u32 %v44_v33, %v43_v40  ;;  %v63_v48 = vsel %vm1094_vm4, %v55_v42, 0  ;;  %v52_v49 = vsel %vm1100_vm5, 0, %v39_v43  ;;  %v946_v1 = vld [vmem:[%s1219_s4 + $0xa0] sm:$0xff]   ;;  %v947_v2 = vld [vmem:[%s1219_s4 + $0x30] sm:$0xff]   ;;  %v948_v3 = vld [vmem:[%s1219_s4 + $0x78] sm:$0xff]  }
  0x12   :  { %881 = vmatprep.mubr.bf16.mxu1 %v63_v48  ;;  %v949_v4 = vld [vmem:[%s1219_s4 + $0xa8] sm:$0xff]   ;;  %v950_v5 = vld [vmem:[%s1219_s4 + $0x38] sm:$0xff]   ;;  %v951_v6 = vld [vmem:[%s1219_s4 + $0xb0] sm:$0xff]  }
  0x13   :  { %v64_v50 = vsel %vm1094_vm4, %v57_v45, 0  ;;  %v53_v51 = vsel %vm1100_vm5, 0, %v46_v46  ;;  %v952_v7 = vld [vmem:[%s1219_s4 + $0xb8] sm:$0xff]  }
  0x14   :  { %798 = vmatpush3.bf16.msra.mxu0 %v919_v14  ;;  %874 = vmatpush3.bf16.msra.mxu1 %v918_v13 }
  0x15   :  { %799 = vmatprep.subr.bf16.mxu0 %v920_v15  ;;  %875 = vmatprep.subr.bf16.mxu1 %v921_v16  ;;  %v761_v15 = vld [vmem:[%s1220_s2] ss:$0 sm:$0xff] }
  0x18   :  { %800 = vmatpush3.bf16.msra.mxu0 %v922_v17  ;;  %876 = vmatpush3.bf16.msra.mxu1 %v921_v16 }
  0x19   :  { %801 = vmatprep.subr.bf16.mxu0 %v923_v18  ;;  %877 = vmatprep.subr.bf16.mxu1 %v924_v19 }
  0x1c   :  { %802 = vmatpush3.bf16.msra.mxu0 %v925_v20  ;;  %878 = vmatpush3.bf16.msra.mxu1 %v924_v19  ;;  %v762_v20 = vld [vmem:[%s1221_s3] ss:$0 sm:$0xff] }
  0x1d   :  { %803 = vmatprep.subr.bf16.mxu0 %v926_v21  ;;  %879 = vmatprep.subr.bf16.mxu1 %v927_v24 }
  0x20   :  { %804 = vmatpush3.bf16.msra.mxu0 %v928_v31  ;;  %880 = vmatpush3.bf16.msra.mxu1 %v927_v24 }
  0x21   :  { %827 = vmatprep.subr.bf16.mxu0 %v929_v34  ;;  %885 = vmatprep.subr.bf16.mxu1 %v934_v47 }
  0x23   :  { %290 = vmatmul.mubr.bf16.vlgmr.msra.gmra.mrb[0].mxu0 %v52_v49  ;;  %882 = vmatmul.mubr.bf16.vlgmr.msra.gmra.mrb[0].mxu1 %v64_v50 }
  0x24   :  { %297 = vmatprep.mubr.bf16.mxu0 %v32_v28  ;;  %828 = vmatpush3.bf16.msra.mxu0 %v930_v41 }
  0x25   :  { %829 = vmatprep.subr.bf16.mxu0 %v931_v44  ;;  %886 = vmatpush3.bf16.msra.mxu1 %v934_v47 }
  0x26   :  { %887 = vmatprep.subr.bf16.mxu1 %v937_v56 }
  0x28   :  { %830 = vmatpush3.bf16.msra.mxu0 %v932_v52 }
  0x29   :  { %831 = vmatprep.subr.bf16.mxu0 %v933_v53  ;;  %888 = vmatpush3.bf16.msra.mxu1 %v937_v56 }
  0x2a   :  { %889 = vmatprep.subr.bf16.mxu1 %v940_v59 }
  0x2b   :  { %298 = vmatmul.mubr.bf16.gmra.mrb[4].mxu0 %v53_v51 }
  0x2c   :  { %832 = vmatpush3.bf16.msra.mxu0 %v935_v54 }
  0x2d   :  { %833 = vmatprep.subr.bf16.mxu0 %v936_v55  ;;  %890 = vmatpush3.bf16.msra.mxu1 %v940_v59 }
  0x2e   :  { %891 = vmatprep.subr.bf16.mxu1 %v943_v62 }
  0x30   :  { %834 = vmatpush3.bf16.msra.mxu0 %v938_v57 }
  0x31   :  { %835 = vmatprep.subr.bf16.mxu0 %v939_v58  ;;  %892 = vmatpush3.bf16.msra.mxu1 %v943_v62 }
  0x32   :  { %893 = vmatprep.subr.bf16.mxu1 %v946_v1 }
  0x34   :  { %836 = vmatpush3.bf16.msra.mxu0 %v941_v60 }
  0x35   :  { %837 = vmatprep.subr.bf16.mxu0 %v942_v61  ;;  %894 = vmatpush3.bf16.msra.mxu1 %v946_v1 }
  0x36   :  { %895 = vmatprep.subr.bf16.mxu1 %v949_v4 }
  0x38   :  { %838 = vmatpush3.bf16.msra.mxu0 %v944_v63 }
  0x39   :  { %839 = vmatprep.subr.bf16.mxu0 %v945_v0  ;;  %896 = vmatpush3.bf16.msra.mxu1 %v949_v4 }
  0x3a   :  { %897 = vmatprep.subr.bf16.mxu1 %v951_v6 }
  0x3c   :  { %840 = vmatpush3.bf16.msra.mxu0 %v947_v2 }
  0x3d   :  { %841 = vmatprep.subr.bf16.mxu0 %v948_v3  ;;  %898 = vmatpush3.bf16.msra.mxu1 %v951_v6 }
  0x3e   :  { %899 = vmatprep.subr.bf16.mxu1 %v952_v7 }
  0x40   :  { %842 = vmatpush3.bf16.msra.mxu0 %v950_v5 }
  0x41   :  { %900 = vmatpush3.bf16.msra.mxu1 %v952_v7 }
  0xf6   :  { %v805_v8 = vpop.f32.mrb[0].mxu0  ;;  %v883_v9 = vpop.f32.mrb[0].mxu1 }
  0xf7   :  { %v806_v10 = vpop.f32.mrb[1].mxu0  ;;  %v340_v11 = vpop.f32.mrb[1].mxu1 }
  0xf8   :  { %v807_v12 = vadd.f32 %v806_v10, %v805_v8  ;;  %v808_v13 = vpop.f32.mrb[2].mxu0  ;;  %v884_v14 = vpop.f32.mrb[2].mxu1 }
  0xf9   :  { %v809_v16 = vpop.f32.mrb[3].mxu0  ;;  %v343_v17 = vpop.f32.mrb[3].mxu1 }
  0xfa   :  { %v341_v18 = vadd.f32 %v807_v12, %v340_v11  ;;  %v810_v19 = vadd.f32 %v809_v16, %v808_v13  ;;  %v787_v11 = vld [vmem:[%s1222_s5] ss:$0 sm:$0xff] }
  0xfc   :  { %v362_v21 = vmul.f32 %v761_v15, %v341_v18  ;;  %v344_v24 = vadd.f32 %v810_v19, %v343_v17 }
  0xfe   :  { %v373_v25 = vadd.f32 %v762_v20, %v362_v21  ;;  %v363_v28 = vmul.f32 %v761_v15, %v344_v24  ;;  %v811_v29 = vpop.f32.mrb[4].mxu0 }
  0xff   :  { %v812_v30 = vpop.f32.mrb[5].mxu0 }
 0x100   :  { %v374_v31 = vadd.f32 %v762_v20, %v363_v28  ;;  %v813_v32 = vadd.f32 %v812_v30, %v811_v29  ;;  %v814_v33 = vpop.f32.mrb[6].mxu0  ;;  %v377_v35 = vmax.f32 %v373_v25, 0.0 }
 0x101   :  { %v815_v34 = vpop.f32.mrb[7].mxu0 }
 0x102   :  { %v378_v37 = vmax.f32 %v374_v31, 0.0  ;;  %v349_v39 = vadd.f32 %v883_v9, %v813_v32  ;;  %v816_v40 = vadd.f32 %v815_v34, %v814_v33 }
 0x104   :  { %v364_v41 = vmul.f32 %v761_v15, %v349_v39  ;;  %v352_v42 = vadd.f32 %v884_v14, %v816_v40  ;;  %v381_v43 = vpack.c.bf16 %v378_v37, %v377_v35 }
 0x106   :  { %v365_v44 = vmul.f32 %v761_v15, %v352_v42  ;;  %v384_v45 = vshrl.u32 %v381_v43, 16  ;;  %v387_v46 = vshll.u32 %v381_v43, 16  ;;  %633 = vmatprep.mubr.bf16.mxu0 %v381_v43  ;;  %v375_v47 = vadd.f32 %v762_v20, %v364_v41  ;;  %v788_v15 = vld [vmem:[%s1223_s6] ss:$0 sm:$0xff] }
 0x108   :  { %v386_v48 = vrot.slane %v384_v45, 7  ;;  %v401_v49 = vrot.slane %v387_v46, 1  ;;  %v376_v50 = vadd.f32 %v762_v20, %v365_v44  ;;  %v379_v53 = vmax.f32 %v375_v47, 0.0 }
 0x10a   :  { %v389_v51 = vor.u32 %v387_v46, %v386_v48  ;;  %v402_v52 = vor.u32 %v401_v49, %v384_v45  ;;  %v380_v54 = vmax.f32 %v376_v50, 0.0 }
 0x10c   :  { %v399_v55 = vsel %vm1100_vm5, 0, %v389_v51  ;;  %v407_v56 = vsel %vm1094_vm4, %v402_v52, 0  ;;  %v382_v57 = vpack.c.bf16 %v380_v54, %v379_v53 }
 0x10d   :  { %634 = vmatmul.mubr.bf16.vlgmr.msra.gmra.mrb[8].mxu0 %v399_v55  ;;  %901 = vmatprep.mubr.bf16.mxu1 %v407_v56 }
 0x10e   :  { %641 = vmatprep.mubr.bf16.mxu0 %v382_v57  ;;  %v391_v58 = vshrl.u32 %v382_v57, 16  ;;  %v394_v59 = vshll.u32 %v382_v57, 16 }
 0x110   :  { %v393_v60 = vrot.slane %v391_v58, 7  ;;  %v403_v61 = vrot.slane %v394_v59, 1 }
 0x112   :  { %v396_v62 = vor.u32 %v394_v59, %v393_v60  ;;  %v404_v63 = vor.u32 %v403_v61, %v391_v58 }
 0x114   :  { %v400_v0 = vsel %vm1100_vm5, 0, %v396_v62  ;;  %v408_v1 = vsel %vm1094_vm4, %v404_v63, 0 }
 0x115   :  { %642 = vmatmul.mubr.bf16.gmra.mrb[12].mxu0 %v400_v0  ;;  %902 = vmatmul.mubr.bf16.vlgmr.msra.gmra.mrb[4].mxu1 %v408_v1 }
 0x1e0   :  { %v843_v2 = vpop.f32.mrb[8].mxu0 }
 0x1e1   :  { %v844_v3 = vpop.f32.mrb[9].mxu0 }
 0x1e2   :  { %v845_v4 = vadd.f32 %v844_v3, %v843_v2  ;;  %v846_v5 = vpop.f32.mrb[10].mxu0 }
 0x1e3   :  { %v847_v6 = vpop.f32.mrb[11].mxu0 }
 0x1e4   :  { %v848_v7 = vadd.f32 %v847_v6, %v846_v5 }
 0x1e8   :  { %v849_v8 = vpop.f32.mrb[12].mxu0  ;;  %v903_v9 = vpop.f32.mrb[4].mxu1 }
 0x1e9   :  { %v850_v10 = vpop.f32.mrb[13].mxu0  ;;  %v684_v38 = vpop.f32.mrb[5].mxu1 }
 0x1ea   :  { %v851_v12 = vadd.f32 %v850_v10, %v849_v8  ;;  %v685_v13 = vadd.f32 %v845_v4, %v684_v38  ;;  %v852_v36 = vpop.f32.mrb[14].mxu0  ;;  %v904_v14 = vpop.f32.mrb[6].mxu1 }
 0x1eb   :  { %v853_v16 = vpop.f32.mrb[15].mxu0  ;;  %v687_v17 = vpop.f32.mrb[7].mxu1 }
 0x1ec   :  { %v693_v18 = vadd.f32 %v903_v9, %v851_v12  ;;  %v706_v19 = vmul.f32 %v787_v11, %v685_v13  ;;  %v854_v20 = vadd.f32 %v853_v16, %v852_v36  ;;  %v688_v21 = vadd.f32 %v848_v7, %v687_v17 }
 0x1ee   :  { %v708_v24 = vmul.f32 %v787_v11, %v693_v18  ;;  %v717_v25 = vadd.f32 %v788_v15, %v706_v19  ;;  %v696_v28 = vadd.f32 %v904_v14, %v854_v20  ;;  %v707_v29 = vmul.f32 %v787_v11, %v688_v21 }
 0x1f0   :  { %v719_v30 = vadd.f32 %v788_v15, %v708_v24  ;;  %v721_v31 = vadd.f32 %v717_v25, %v1062_v22  ;;  %v709_v32 = vmul.f32 %v787_v11, %v696_v28  ;;  %v718_v33 = vadd.f32 %v788_v15, %v707_v29 }
 0x1f2   :  { %v723_v34 = vadd.f32 %v719_v30, %v1077_v26  ;;  %v725_v35 = vmax.f32 %v721_v31, 0.0  ;;  %v720_v37 = vadd.f32 %v788_v15, %v709_v32  ;;  %v722_v39 = vadd.f32 %v718_v33, %v1067_v23 }
 0x1f4   :  { %v727_v40 = vmax.f32 %v723_v34, 0.0  ;;  %729 = vst [vmem:[%s1224_s7] sm:$0xff] %v725_v35  ;;  %v724_v41 = vadd.f32 %v720_v37, %v1082_v27  ;;  %v726_v42 = vmax.f32 %v722_v39, 0.0 }
 0x1f6   :  { %731 = vst [vmem:[%s1224_s7 + $0x10] sm:$0xff] %v727_v40  ;;  %v728_v22 = vmax.f32 %v724_v41, 0.0  ;;  %730 = vst [vmem:[%s1224_s7 + $0x8] sm:$0xff] %v726_v42 }
 0x1f8   :  { %732 = vst [vmem:[%s1224_s7 + $0x18] sm:$0xff] %v728_v22 }

</bundles_post_ra>
